<compile_context>
chip_gen: v7x
topology: tpu7x:2x2x1
jax: 0.10.0
libtpu: 0.0.40
codegen_flags: <defaults>
</compile_context>

<pallas_src>
import functools

import jax
import jax.numpy as jnp
from jax.experimental import pallas as pl
from jax.experimental.pallas import tpu as pltpu


def _round_up(x, m):
    return (x + m - 1) // m * m


def policy_kernel(x_ref, w1_ref, b1_ref, w2_ref, b2_ref, w3_ref, b3_ref, o_ref):
    # x arrives as f32; cast to bf16 in-kernel for the MXU, accumulate in f32.
    x = x_ref[...].astype(jnp.bfloat16)
    h = jnp.dot(x, w1_ref[...],
                preferred_element_type=jnp.float32)            # (tb, H) f32
    h = jnp.maximum(h + b1_ref[...], 0.0)                      # f32 bias + relu
    h = jnp.dot(h.astype(jnp.bfloat16), w2_ref[...],
                preferred_element_type=jnp.float32)            # (tb, H) f32
    h = jnp.maximum(h + b2_ref[...], 0.0)
    h = jnp.dot(h.astype(jnp.bfloat16), w3_ref[...],
                preferred_element_type=jnp.float32)            # (tb, A) f32
    o_ref[...] = jnp.tanh(h + b3_ref[...])                     # unpadded store


@functools.partial(jax.jit, static_argnames=("block_b",))
def policy_forward(x, params, block_b=1024):
    """x: (B, state_dim) float32 -> (B, action_dim) float32."""
    w1, b1, w2, b2, w3, b3 = params
    B, S = x.shape
    H = w1.shape[1]
    A = w3.shape[1]

    # bf16 MXU weights (no-op under jit if params were prepared via prepare_params).
    w1 = w1.astype(jnp.bfloat16)
    w2 = w2.astype(jnp.bfloat16)
    w3 = w3.astype(jnp.bfloat16)

    # --- Batch tile selection --------------------------------------------------
    # Small B: one grid step, block == full array (always satisfies tiling rules,
    # no batch padding, no masking).
    # Medium B: split into >= 2 steps so v7x's two TensorCores both get work.
    # Large B: fixed block_b-row tiles (multiple of 128, MXU-filling).
    if B <= 256:
        tb = B
    elif B <= 2 * block_b:
        tb = _round_up(pl.cdiv(B, 2), 128)
    else:
        tb = block_b
    grid = (pl.cdiv(B, tb),)   # partial boundary block is masked by Pallas; no pad.

    # Constant index_map -> block stays resident in VMEM across grid steps.
    resident = lambda shape: pl.BlockSpec(shape, lambda i: (0, 0))

    out = pl.pallas_call(
        policy_kernel,
        out_shape=jax.ShapeDtypeStruct((B, A), jnp.float32),
        grid_spec=pltpu.PrefetchScalarGridSpec(
            num_scalar_prefetch=0,
            grid=grid,
            in_specs=[
                pl.BlockSpec((tb, S), lambda i: (i, 0)),   # x tile (f32, cast in-kernel)
                resident((S, H)),                          # W1 (bf16)
                resident((1, H)),                          # b1 (f32)
                resident((H, H)),                          # W2 (bf16)
                resident((1, H)),                          # b2 (f32)
                resident((H, A)),                          # W3 (bf16, unpadded)
                resident((1, A)),                          # b3 (f32, unpadded)
            ],
            out_specs=pl.BlockSpec((tb, A), lambda i: (i, 0)),
        ),
        compiler_params=pltpu.CompilerParams(
            # Batch steps are independent -> shard across TensorCores on v7x.
            dimension_semantics=("parallel",),
        ),
    )(x, w1, b1, w2, b2, w3, b3)

    return out


def prepare_params(params):
    """One-time bf16 cast of the weights (biases stay f32)."""
    w1, b1, w2, b2, w3, b3 = params
    return (w1.astype(jnp.bfloat16), b1,
            w2.astype(jnp.bfloat16), b2,
            w3.astype(jnp.bfloat16), b3)


def init_policy_params(key, state_dim, action_dim, hidden=256):
    """Deterministic init mirroring nn.Linear's U(-1/sqrt(fan_in), 1/sqrt(fan_in))."""
    ks = jax.random.split(key, 6)

    def linear(kw, kb, fan_in, fan_out):
        bound = 1.0 / jnp.sqrt(fan_in)
        w = jax.random.uniform(kw, (fan_in, fan_out), jnp.float32, -bound, bound)
        b = jax.random.uniform(kb, (1, fan_out), jnp.float32, -bound, bound)
        return w, b

    w1, b1 = linear(ks[0], ks[1], state_dim, hidden)
    w2, b2 = linear(ks[2], ks[3], hidden, hidden)
    w3, b3 = linear(ks[4], ks[5], hidden, action_dim)
    return (w1, b1, w2, b2, w3, b3)


def policy_reference(x, params):
    """Pure-JAX f32 reference matching the PyTorch module."""
    w1, b1, w2, b2, w3, b3 = params
    h = jnp.maximum(x @ w1 + b1, 0.0)
    h = jnp.maximum(h @ w2 + b2, 0.0)
    return jnp.tanh(h @ w3 + b3)


if __name__ == "__main__":
    key = jax.random.PRNGKey(0)
    k_param, k_x1, k_x2 = jax.random.split(key, 3)

    state_dim, action_dim = 16, 8
    params_f32 = init_policy_params(k_param, state_dim, action_dim)
    params_bf = prepare_params(params_f32)   # bf16 weights cast once, outside jit

    # --- Small batch: single grid step, block == full array -------------------
    x_small = jax.random.normal(k_x1, (8, state_dim), jnp.float32)
    y_small = jax.block_until_ready(policy_forward(x_small, params_bf))
    ref_small = policy_reference(x_small, params_f32)
    assert y_small.shape == (8, action_dim)
    # bf16 MXU inputs with f32 accumulation: intentional accuracy trade-off vs the
    # f32 PyTorch reference; tolerance covers the bf16 rounding of x / W / h.
    assert jnp.allclose(y_small, ref_small, atol=3e-2, rtol=3e-2), (
        f"small-batch max abs err {jnp.max(jnp.abs(y_small - ref_small))}"
    )

    # --- Ragged batch: tiled path with a partial boundary block ---------------
    # B=300 -> tb=256, grid=2; verifies the no-pad boundary-block handling.
    x_big = jax.random.normal(k_x2, (300, state_dim), jnp.float32)
    y_big = jax.block_until_ready(policy_forward(x_big, params_bf))
    ref_big = policy_reference(x_big, params_f32)
    assert y_big.shape == (300, action_dim)
    assert jnp.allclose(y_big, ref_big, atol=3e-2, rtol=3e-2), (
        f"ragged-batch max abs err {jnp.max(jnp.abs(y_big - ref_big))}"
    )

    print("KERNEL_OK")
</pallas_src>

<mosaic_0001>
module attributes {stable_mosaic.version = 11 : i64} {
  func.func @policy_kernel(%arg0: i32, %arg1: memref<8x16xf32, #tpu.memory_space<vmem>>, %arg2: memref<16x256xbf16, #tpu.memory_space<vmem>>, %arg3: memref<1x256xf32, #tpu.memory_space<vmem>>, %arg4: memref<256x256xbf16, #tpu.memory_space<vmem>>, %arg5: memref<1x256xf32, #tpu.memory_space<vmem>>, %arg6: memref<256x8xbf16, #tpu.memory_space<vmem>>, %arg7: memref<1x8xf32, #tpu.memory_space<vmem>>, %arg8: memref<8x8xf32, #tpu.memory_space<vmem>>) attributes {dimension_semantics = [#tpu.dimension_semantics<parallel>], iteration_bounds = array<i64: 1>, scalar_prefetch = 0 : i64, scratch_operands = 0 : i64, tpu.core_type = #tpu.core_type<tc>, window_params = [{transform_indices = @transform_0, window_bounds = array<i64: 8, 16>}, {pipeline_mode = #tpu.pipeline_mode<synchronous>, transform_indices = @transform_1, window_bounds = array<i64: 16, 256>}, {pipeline_mode = #tpu.pipeline_mode<synchronous>, transform_indices = @transform_2, window_bounds = array<i64: 1, 256>}, {pipeline_mode = #tpu.pipeline_mode<synchronous>, transform_indices = @transform_3, window_bounds = array<i64: 256, 256>}, {pipeline_mode = #tpu.pipeline_mode<synchronous>, transform_indices = @transform_4, window_bounds = array<i64: 1, 256>}, {pipeline_mode = #tpu.pipeline_mode<synchronous>, transform_indices = @transform_5, window_bounds = array<i64: 256, 8>}, {pipeline_mode = #tpu.pipeline_mode<synchronous>, transform_indices = @transform_6, window_bounds = array<i64: 1, 8>}, {transform_indices = @transform_7, window_bounds = array<i64: 8, 8>}]} {
    %c0 = arith.constant 0 : index
    %c0_0 = arith.constant 0 : index
    %0 = vector.load %arg1[%c0, %c0_0] : memref<8x16xf32, #tpu.memory_space<vmem>>, vector<8x16xf32>
    %1 = arith.truncf %0 : vector<8x16xf32> to vector<8x16xbf16>
    %c0_1 = arith.constant 0 : index
    %c0_2 = arith.constant 0 : index
    %2 = vector.load %arg2[%c0_1, %c0_2] : memref<16x256xbf16, #tpu.memory_space<vmem>>, vector<16x256xbf16>
    %cst = arith.constant dense<0.000000e+00> : vector<8x256xf32>
    %3 = tpu.matmul %1, %2, %cst {dimension_numbers = #tpu.dot_dimension_numbers<[1], [0], [0], [1], [0, 0, 1, 1], [], []>} : vector<8x16xbf16>, vector<16x256xbf16>, vector<8x256xf32> -> vector<8x256xf32>
    %c0_3 = arith.constant 0 : index
    %c0_4 = arith.constant 0 : index
    %4 = vector.load %arg3[%c0_3, %c0_4] : memref<1x256xf32, #tpu.memory_space<vmem>>, vector<1x256xf32>
    %5 = vector.broadcast %4 : vector<1x256xf32> to vector<8x256xf32>
    %6 = arith.addf %3, %5 : vector<8x256xf32>
    %cst_5 = arith.constant 0.000000e+00 : f32
    %7 = vector.broadcast %cst_5 : f32 to vector<8x256xf32>
    %8 = arith.maximumf %6, %7 : vector<8x256xf32>
    %9 = arith.truncf %8 : vector<8x256xf32> to vector<8x256xbf16>
    %c0_6 = arith.constant 0 : index
    %c0_7 = arith.constant 0 : index
    %10 = vector.load %arg4[%c0_6, %c0_7] : memref<256x256xbf16, #tpu.memory_space<vmem>>, vector<256x256xbf16>
    %cst_8 = arith.constant dense<0.000000e+00> : vector<8x256xf32>
    %11 = tpu.matmul %9, %10, %cst_8 {dimension_numbers = #tpu.dot_dimension_numbers<[1], [0], [0], [1], [0, 0, 1, 1], [], []>} : vector<8x256xbf16>, vector<256x256xbf16>, vector<8x256xf32> -> vector<8x256xf32>
    %c0_9 = arith.constant 0 : index
    %c0_10 = arith.constant 0 : index
    %12 = vector.load %arg5[%c0_9, %c0_10] : memref<1x256xf32, #tpu.memory_space<vmem>>, vector<1x256xf32>
    %13 = vector.broadcast %12 : vector<1x256xf32> to vector<8x256xf32>
    %14 = arith.addf %11, %13 : vector<8x256xf32>
    %cst_11 = arith.constant 0.000000e+00 : f32
    %15 = vector.broadcast %cst_11 : f32 to vector<8x256xf32>
    %16 = arith.maximumf %14, %15 : vector<8x256xf32>
    %17 = arith.truncf %16 : vector<8x256xf32> to vector<8x256xbf16>
    %c0_12 = arith.constant 0 : index
    %c0_13 = arith.constant 0 : index
    %18 = vector.load %arg6[%c0_12, %c0_13] : memref<256x8xbf16, #tpu.memory_space<vmem>>, vector<256x8xbf16>
    %cst_14 = arith.constant dense<0.000000e+00> : vector<8x8xf32>
    %19 = tpu.matmul %17, %18, %cst_14 {dimension_numbers = #tpu.dot_dimension_numbers<[1], [0], [0], [1], [0, 0, 1, 1], [], []>} : vector<8x256xbf16>, vector<256x8xbf16>, vector<8x8xf32> -> vector<8x8xf32>
    %c0_15 = arith.constant 0 : index
    %c0_16 = arith.constant 0 : index
    %20 = vector.load %arg7[%c0_15, %c0_16] : memref<1x8xf32, #tpu.memory_space<vmem>>, vector<1x8xf32>
    %21 = vector.broadcast %20 : vector<1x8xf32> to vector<8x8xf32>
    %22 = arith.addf %19, %21 : vector<8x8xf32>
    %23 = math.tanh %22 : vector<8x8xf32>
    %c0_17 = arith.constant 0 : index
    %c0_18 = arith.constant 0 : index
    %24 = vector.load %arg8[%c0_17, %c0_18] : memref<8x8xf32, #tpu.memory_space<vmem>>, vector<8x8xf32>
    tpu.vector_store %arg8[%c0_17, %c0_18], %23 {strides = array<i32>} : memref<8x8xf32, #tpu.memory_space<vmem>>, vector<8x8xf32>,
    return
  }
  func.func @transform_0(%arg0: i32) -> (i32, i32) {
    %c0_i32 = arith.constant 0 : i32
    %c0_i32_0 = arith.constant 0 : i32
    return %arg0, %c0_i32 : i32, i32
  }
  func.func @transform_1(%arg0: i32) -> (i32, i32) {
    %c0_i32 = arith.constant 0 : i32
    %c0_i32_0 = arith.constant 0 : i32
    %c0_i32_1 = arith.constant 0 : i32
    return %c0_i32, %c0_i32_0 : i32, i32
  }
  func.func @transform_2(%arg0: i32) -> (i32, i32) {
    %c0_i32 = arith.constant 0 : i32
    %c0_i32_0 = arith.constant 0 : i32
    %c0_i32_1 = arith.constant 0 : i32
    return %c0_i32, %c0_i32_0 : i32, i32
  }
  func.func @transform_3(%arg0: i32) -> (i32, i32) {
    %c0_i32 = arith.constant 0 : i32
    %c0_i32_0 = arith.constant 0 : i32
    %c0_i32_1 = arith.constant 0 : i32
    return %c0_i32, %c0_i32_0 : i32, i32
  }
  func.func @transform_4(%arg0: i32) -> (i32, i32) {
    %c0_i32 = arith.constant 0 : i32
    %c0_i32_0 = arith.constant 0 : i32
    %c0_i32_1 = arith.constant 0 : i32
    return %c0_i32, %c0_i32_0 : i32, i32
  }
  func.func @transform_5(%arg0: i32) -> (i32, i32) {
    %c0_i32 = arith.constant 0 : i32
    %c0_i32_0 = arith.constant 0 : i32
    %c0_i32_1 = arith.constant 0 : i32
    return %c0_i32, %c0_i32_0 : i32, i32
  }
  func.func @transform_6(%arg0: i32) -> (i32, i32) {
    %c0_i32 = arith.constant 0 : i32
    %c0_i32_0 = arith.constant 0 : i32
    %c0_i32_1 = arith.constant 0 : i32
    return %c0_i32, %c0_i32_0 : i32, i32
  }
  func.func @transform_7(%arg0: i32) -> (i32, i32) {
    %c0_i32 = arith.constant 0 : i32
    %c0_i32_0 = arith.constant 0 : i32
    return %arg0, %c0_i32 : i32, i32
  }
}

</mosaic_0001>

<bundles_post_ra>
// kernel: policy_forward.1
= control target key start
LH: loop header
LB: loop body
LE: loop exit
PB: predicated region body
PF: predicated region fallthrough
CT: control target
= control target key end

     0   :  { %12 = vsyncpa [#allocation3], 0  ;;  %s890_s0 = inlined_call_operand.vmem [shape: f32[8,16], index: 0, kind: input, shape index: {}]   ;;  %s891_s1 = inlined_call_operand.vmem [shape: bf16[16,256], index: 1, kind: input, shape index: {}]   ;;  %s892_s2 = inlined_call_operand.vmem [shape: f32[1,256], index: 2, kind: input, shape index: {}]   ;;  %s893_s3 = inlined_call_operand.hbm [shape: bf16[256,256], index: 3, kind: input, shape index: {}]   ;;  %s894_s4 = inlined_call_operand.vmem [shape: f32[1,256], index: 4, kind: input, shape index: {}]   ;;  %s895_s5 = inlined_call_operand.vmem [shape: bf16[256,8], index: 5, kind: input, shape index: {}]   ;;  %s896_s6 = inlined_call_operand.vmem [shape: f32[1,8], index: 6, kind: input, shape index: {}]   ;;  %s897_s7 = inlined_call_operand.hbm [shape: f32[8,8], index: 7, kind: output, shape index: {}]  }
   0x1   :  { %13 = vsyncpa [#allocation4], 0  ;;  %s755_s24 = smov [#allocation2]   ;;  %s707_s28 = scalar_lea.hbm %s893_s3, 4096 }
   0x2   :  { %s25_s25 = sshll.u32 %s755_s24, 4  ;;  %p708_p0 = scmp.ne.s32.totalorder %s893_s3, %s707_s28  ;;  %s26_s25 = int_to_ptr.vmem [resolvable:$true] %s25_s25 }
   0x3   :  { %p711_p1 = scmp.lt.u32.totalorder %s707_s28, %s893_s3 }
   0x5   :  { %p713_p2 = pnand %p711_p1, %p708_p0 }
   0x7   :  { %716 = shalt.err (!%p713_p2)
}
   0x8   :  { %s717_s10 = scalar_lea.vmem %s26_s25, 4096  ;;  %p722_p4 = scmp.lt.s32.totalorder %s26_s25, %s26_s25 }
   0x9   :  { %p718_p3 = scmp.ne.s32.totalorder %s26_s25, %s717_s10  ;;  %p723_p5 = scmp.lt.s32.totalorder %s717_s10, %s717_s10 }
   0xb   :  { %p724_p6 = por %p723_p5, %p722_p4 }
   0xd   :  { %p725_p7 = pnand %p724_p6, %p718_p3 }
   0xf   :  { %728 = shalt.err (!%p725_p7)
}
  0x10   :  { %s756_s11 = smov 128   ;;  %s757_s12 = smov 8  }
  0x11   :  { %31 = dma.hbm_to_vmem [thread:$0]  %s893_s3, 4096, %s26_s25, [#allocation3], %s756_s11, %s756_s11, %s757_s12  }
  0x12   :  { %751 = dma.done.wait [#allocation3], 4096  }
  0x13   :  { %752 = vsyncadd [#allocation3], 4294963200  ;;  %v758_v0 = vmov 0   ;;  %v638_v1 = vld [vmem:[%s891_s1 + $0x4] ss:$8 sps:$4 sm:$0xff]   ;;  %vm68_vm0 = vcmask 130048   ;;  %v48_v49 = vlaneseq }
  0x14   :  { %104 = vmatprep.mubr.bf16.mxu0 %v758_v0  ;;  %v640_v2 = vld [vmem:[%s891_s1] ss:$8 sps:$4 sm:$0xff]   ;;  %72 = vmatprep.subr.bf16.mxu0 %v638_v1  ;;  %v641_v5 = vld [vmem:[#allocation2 + $0x4] ss:$8 sps:$4 sm:$0xff]   ;;  %v644_v7 = vld [vmem:[#allocation2 + $0x14] ss:$8 sps:$4 sm:$0xff]  }
  0x15   :  { %v42_v3 = vld [vmem:[%s890_s0] sm:$0xff]  ;;  %73 = vmatpush1.bf16.msra.mxu0 %v640_v2  ;;  %321 = vmatprep.subr.bf16.mxu1 %v641_v5  ;;  %v646_v8 = vld [vmem:[#allocation2 + $0x10] ss:$8 sps:$4 sm:$0xff]   ;;  %v650_v11 = vld [vmem:[#allocation2 + $0x34] ss:$8 sps:$4 sm:$0xff]   ;;  %v49_v50 = vshrl.u32 %v48_v49, 7 }
  0x16   :  { %v43_v4 = vpack.c.bf16 %v42_v3, %v42_v3  ;;  %v643_v6 = vld [vmem:[#allocation2] ss:$8 sps:$4 sm:$0xff]   ;;  %v647_v9 = vld [vmem:[#allocation2 + $0x24] ss:$8 sps:$4 sm:$0xff]   ;;  %v652_v12 = vld [vmem:[#allocation2 + $0x30] ss:$8 sps:$4 sm:$0xff]  }
  0x17   :  { %322 = vmatpush1.bf16.msra.mxu1 %v643_v6  ;;  %v649_v10 = vld [vmem:[#allocation2 + $0x20] ss:$8 sps:$4 sm:$0xff]   ;;  %v653_v13 = vld [vmem:[#allocation2 + $0x44] ss:$8 sps:$4 sm:$0xff]   ;;  %v656_v15 = vld [vmem:[#allocation2 + $0x54] ss:$8 sps:$4 sm:$0xff]  }
  0x18   :  { %561 = vmatmul.mubr.msk.bf16.vlgmr.msra.gmra.mrb[0].mxu0 %vm68_vm0, %v43_v4  ;;  %323 = vmatprep.subr.bf16.mxu1 %v644_v7  ;;  %v655_v14 = vld [vmem:[#allocation2 + $0x40] ss:$8 sps:$4 sm:$0xff]   ;;  %v658_v16 = vld [vmem:[#allocation2 + $0x50] ss:$8 sps:$4 sm:$0xff]   ;;  %v659_v17 = vld [vmem:[#allocation2 + $0x64] ss:$8 sps:$4 sm:$0xff]  }
  0x19   :  { %v661_v18 = vld [vmem:[#allocation2 + $0x60] ss:$8 sps:$4 sm:$0xff]   ;;  %v662_v19 = vld [vmem:[#allocation2 + $0x74] ss:$8 sps:$4 sm:$0xff]   ;;  %v664_v20 = vld [vmem:[#allocation2 + $0x70] ss:$8 sps:$4 sm:$0xff]  }
  0x1a   :  { %v665_v21 = vld [vmem:[#allocation2 + $0x84] ss:$8 sps:$4 sm:$0xff]   ;;  %v667_v22 = vld [vmem:[#allocation2 + $0x80] ss:$8 sps:$4 sm:$0xff]   ;;  %v668_v23 = vld [vmem:[#allocation2 + $0x94] ss:$8 sps:$4 sm:$0xff]  }
  0x1b   :  { %324 = vmatpush1.bf16.msra.mxu1 %v646_v8  ;;  %v670_v24 = vld [vmem:[#allocation2 + $0x90] ss:$8 sps:$4 sm:$0xff]   ;;  %v671_v25 = vld [vmem:[#allocation2 + $0xa4] ss:$8 sps:$4 sm:$0xff]   ;;  %v673_v26 = vld [vmem:[#allocation2 + $0xa0] ss:$8 sps:$4 sm:$0xff]  }
  0x1c   :  { %325 = vmatprep.subr.bf16.mxu1 %v647_v9  ;;  %v674_v27 = vld [vmem:[#allocation2 + $0xb4] ss:$8 sps:$4 sm:$0xff]   ;;  %v676_v28 = vld [vmem:[#allocation2 + $0xb0] ss:$8 sps:$4 sm:$0xff]   ;;  %v677_v29 = vld [vmem:[#allocation2 + $0xc4] ss:$8 sps:$4 sm:$0xff]  }
  0x1d   :  { %v679_v30 = vld [vmem:[#allocation2 + $0xc0] ss:$8 sps:$4 sm:$0xff]   ;;  %v680_v31 = vld [vmem:[#allocation2 + $0xd4] ss:$8 sps:$4 sm:$0xff]   ;;  %v682_v32 = vld [vmem:[#allocation2 + $0xd0] ss:$8 sps:$4 sm:$0xff]  }
  0x1e   :  { %v683_v33 = vld [vmem:[#allocation2 + $0xe4] ss:$8 sps:$4 sm:$0xff]   ;;  %v685_v34 = vld [vmem:[#allocation2 + $0xe0] ss:$8 sps:$4 sm:$0xff]   ;;  %v686_v35 = vld [vmem:[#allocation2 + $0xf4] ss:$8 sps:$4 sm:$0xff]  }
  0x1f   :  { %326 = vmatpush1.bf16.msra.mxu1 %v649_v10  ;;  %v688_v36 = vld [vmem:[#allocation2 + $0xf0] ss:$8 sps:$4 sm:$0xff]   ;;  %v689_v37 = vld [vmem:[%s895_s5 + $0x40] sm:$0xff]   ;;  %v691_v39 = vld [vmem:[%s895_s5 + $0x48] sm:$0xff]   ;;  %v50_v51 = vsub.s32 0, %v49_v50  ;;  %v54_v53 = vsub.s32 1, %v49_v50 }
  0x20   :  { %327 = vmatprep.subr.bf16.mxu1 %v650_v11  ;;  %v690_v38 = vld [vmem:[%s895_s5] sm:$0xff]   ;;  %611 = vmatprep.subr.bf16.mxu0 %v689_v37  ;;  %v692_v40 = vld [vmem:[%s895_s5 + $0x8] sm:$0xff]   ;;  %v693_v41 = vld [vmem:[%s895_s5 + $0x50] sm:$0xff]   ;;  %vm542_vm1 = vcmask 64512  }
  0x21   :  { %612 = vmatpush3.bf16.msra.mxu0 %v690_v38  ;;  %v694_v42 = vld [vmem:[%s895_s5 + $0x10] sm:$0xff]   ;;  %v695_v43 = vld [vmem:[%s895_s5 + $0x58] sm:$0xff]   ;;  %v697_v45 = vld [vmem:[%s895_s5 + $0x60] sm:$0xff]  }
  0x22   :  { %613 = vmatprep.subr.bf16.mxu0 %v691_v39  ;;  %v696_v44 = vld [vmem:[%s895_s5 + $0x18] sm:$0xff]   ;;  %v698_v46 = vld [vmem:[%s895_s5 + $0x20] sm:$0xff]   ;;  %v699_v47 = vld [vmem:[%s895_s5 + $0x68] sm:$0xff]  }
  0x23   :  { %328 = vmatpush1.bf16.msra.mxu1 %v652_v12  ;;  %v700_v48 = vld [vmem:[%s895_s5 + $0x28] sm:$0xff]   ;;  %v46_v52 = vld [vmem:[%s892_s2] sm:$0x3]  ;;  %v701_v2 = vld [vmem:[%s895_s5 + $0x70] sm:$0xff]  }
  0x24   :  { %329 = vmatprep.subr.bf16.mxu1 %v653_v13  ;;  %v51_v54 = vrot.slane %v46_v52, %v50_v51  ;;  %v55_v55 = vrot.slane %v46_v52, %v54_v53  ;;  %v702_v3 = vld [vmem:[%s895_s5 + $0x30] sm:$0xff]   ;;  %v703_v4 = vld [vmem:[%s895_s5 + $0x78] sm:$0xff]   ;;  %v149_v6 = vld [vmem:[%s894_s4] sm:$0x3]  ;;  %s759_s4 = smov [#allocation5]  }
  0x25   :  { %614 = vmatpush3.bf16.msra.mxu0 %v692_v40  ;;  %v704_v5 = vld [vmem:[%s895_s5 + $0x38] sm:$0xff]   ;;  %v154_v7 = vrot.slane %v149_v6, %v50_v51  ;;  %v158_v8 = vrot.slane %v149_v6, %v54_v53  ;;  %s550_s28 = sshll.u32 %s759_s4, 4  ;;  %s551_s28 = int_to_ptr.vmem [resolvable:$true] %s550_s28 }
  0x26   :  { %615 = vmatprep.subr.bf16.mxu0 %v693_v41  ;;  %s729_s29 = scalar_lea.vmem %s551_s28, 128  ;;  %p734_p9 = scmp.lt.s32.totalorder %s551_s28, %s551_s28 }
  0x27   :  { %330 = vmatpush1.bf16.msra.mxu1 %v655_v14  ;;  %p730_p8 = scmp.ne.s32.totalorder %s551_s28, %s729_s29  ;;  %p735_p10 = scmp.lt.s32.totalorder %s729_s29, %s729_s29 }
  0x28   :  { %331 = vmatprep.subr.bf16.mxu1 %v656_v15 }
  0x29   :  { %616 = vmatpush3.bf16.msra.mxu0 %v694_v42  ;;  %p736_p11 = por %p735_p10, %p734_p9 }
  0x2a   :  { %617 = vmatprep.subr.bf16.mxu0 %v695_v43 }
  0x2b   :  { %332 = vmatpush1.bf16.msra.mxu1 %v658_v16  ;;  %p737_p12 = pnand %p736_p11, %p730_p8 }
  0x2c   :  { %333 = vmatprep.subr.bf16.mxu1 %v659_v17 }
  0x2d   :  { %618 = vmatpush3.bf16.msra.mxu0 %v696_v44 }
  0x2e   :  { %619 = vmatprep.subr.bf16.mxu0 %v697_v45 }
  0x2f   :  { %334 = vmatpush1.bf16.msra.mxu1 %v661_v18 }
  0x30   :  { %335 = vmatprep.subr.bf16.mxu1 %v662_v19 }
  0x31   :  { %620 = vmatpush3.bf16.msra.mxu0 %v698_v46 }
  0x32   :  { %621 = vmatprep.subr.bf16.mxu0 %v699_v47 }
  0x33   :  { %336 = vmatpush1.bf16.msra.mxu1 %v664_v20  ;;  %v594_v20 = vld [vmem:[%s896_s6] ss:$0 sm:$0xff] }
  0x34   :  { %337 = vmatprep.subr.bf16.mxu1 %v665_v21 }
  0x35   :  { %622 = vmatpush3.bf16.msra.mxu0 %v700_v48 }
  0x36   :  { %623 = vmatprep.subr.bf16.mxu0 %v701_v2 }
  0x37   :  { %338 = vmatpush1.bf16.msra.mxu1 %v667_v22 }
  0x38   :  { %339 = vmatprep.subr.bf16.mxu1 %v668_v23 }
  0x39   :  { %624 = vmatpush3.bf16.msra.mxu0 %v702_v3 }
  0x3a   :  { %625 = vmatprep.subr.bf16.mxu0 %v703_v4 }
  0x3b   :  { %340 = vmatpush1.bf16.msra.mxu1 %v670_v24 }
  0x3c   :  { %341 = vmatprep.subr.bf16.mxu1 %v671_v25 }
  0x3d   :  { %626 = vmatpush3.bf16.msra.mxu0 %v704_v5 }
  0x3f   :  { %342 = vmatpush1.bf16.msra.mxu1 %v673_v26 }
  0x40   :  { %343 = vmatprep.subr.bf16.mxu1 %v674_v27 }
  0x43   :  { %344 = vmatpush1.bf16.msra.mxu1 %v676_v28 }
  0x44   :  { %345 = vmatprep.subr.bf16.mxu1 %v677_v29 }
  0x47   :  { %346 = vmatpush1.bf16.msra.mxu1 %v679_v30 }
  0x48   :  { %347 = vmatprep.subr.bf16.mxu1 %v680_v31 }
  0x4b   :  { %348 = vmatpush1.bf16.msra.mxu1 %v682_v32 }
  0x4c   :  { %349 = vmatprep.subr.bf16.mxu1 %v683_v33 }
  0x4f   :  { %350 = vmatpush1.bf16.msra.mxu1 %v685_v34 }
  0x50   :  { %351 = vmatprep.subr.bf16.mxu1 %v686_v35 }
  0x53   :  { %352 = vmatpush1.bf16.msra.mxu1 %v688_v36 }
  0xeb   :  { %v106_v56 = vpop.f32.mrb[0].mxu0 }
  0xec   :  { %v107_v57 = vadd.f32 %v106_v56, %v51_v54  ;;  %v108_v58 = vpop.f32.mrb[1].mxu0 }
  0xed   :  { %v109_v59 = vadd.f32 %v108_v58, %v55_v55  ;;  %v110_v60 = vpop.f32.mrb[2].mxu0 }
  0xee   :  { %v113_v61 = vmax.f32 %v107_v57, 0.0  ;;  %v111_v62 = vpop.f32.mrb[3].mxu0 }
  0xef   :  { %v114_v63 = vmax.f32 %v109_v59, 0.0 }
  0xf0   :  { %v115_v1 = vpack.c.bf16 %v113_v61, %v113_v61 }
  0xf1   :  { %v116_v0 = vpack.c.bf16 %v114_v63, %v114_v63 }
  0xf3   :  { %353 = vmatprep.mubr.bf16.mxu1 %v116_v0 }
  0xf4   :  { %354 = vmatmul.mubr.bf16.vlgmr.msra.gmra.mrb[0].mxu1 %v115_v1 }
 0x1c7   :  { %v355_v9 = vpop.f32.mrb[0].mxu1 }
 0x1c8   :  { %v356_v10 = vadd.f32 %v355_v9, %v154_v7  ;;  %v357_v11 = vpop.f32.mrb[1].mxu1 }
 0x1c9   :  { %v358_v12 = vadd.f32 %v357_v11, %v158_v8  ;;  %v359_v13 = vpop.f32.mrb[2].mxu1 }
 0x1ca   :  { %v362_v14 = vmax.f32 %v356_v10, 0.0  ;;  %v360_v15 = vpop.f32.mrb[3].mxu1 }
 0x1cb   :  { %v363_v16 = vmax.f32 %v358_v12, 0.0 }
 0x1cc   :  { %v364_v18 = vpack.c.bf16 %v362_v14, %v362_v14 }
 0x1cd   :  { %v365_v17 = vpack.c.bf16 %v363_v16, %v363_v16 }
 0x1cf   :  { %533 = vmatprep.mubr.bf16.mxu0 %v365_v17 }
 0x1d0   :  { %534 = vmatmul.mubr.bf16.vlgmr.msra.gmra.mrb[4].mxu0 %v364_v18 }
 0x2a3   :  { %v627_v19 = vpop.f32.mrb[4].mxu0 }
 0x2a4   :  { %v628_v21 = vpop.f32.mrb[5].mxu0 }
 0x2a5   :  { %v629_v22 = vadd.f32 %v628_v21, %v627_v19  ;;  %v630_v23 = vpop.f32.mrb[6].mxu0 }
 0x2a6   :  { %v631_v24 = vpop.f32.mrb[7].mxu0 }
 0x2a7   :  { %v536_v25 = vadd.f32 %v629_v22, %v594_v20 }
 0x2a9   :  { %705 = vtanh.f32 %v536_v25 }
 0x2b3   :  { %v706_v26 = vpop.eup %705 }
 0x2b4   :  { %543 = vst.msk [vmem:[#allocation5] sm:$0xff] %vm542_vm1, %v706_v26 }
 0x2b5   :  { %740 = shalt.err (!%p737_p12)
}
 0x2b6   :  { %s741_s8 = scalar_lea.hbm %s897_s7, 128 }
 0x2b7   :  { %p742_p13 = scmp.ne.s32.totalorder %s897_s7, %s741_s8  ;;  %p745_p0 = scmp.lt.u32.totalorder %s741_s8, %s897_s7 }
 0x2b9   :  { %p747_p1 = pnand %p745_p0, %p742_p13 }
 0x2bb   :  { %750 = shalt.err (!%p747_p1)
}
 0x2bc   :  { %553 = dma.vmem_to_hbm [thread:$0]  %s551_s28, 128, %s897_s7, [#allocation4]  }
 0x2bd   :  { %753 = dma.done.wait [#allocation4], 128  }
 0x2be   :  { %754 = vsyncadd [#allocation4], 4294967168 }
 0x2bf   :  { %557 = vsyncpa [#allocation3], 1 }
 0x2c0   :  { %558 = vsyncpa [#allocation4], 1 }

</bundles_post_ra>
